<compile_context>
chip_gen: v6e
topology: v6e:2x2x1
jax: 0.10.0
libtpu: 0.0.40
codegen_flags: <defaults>
</compile_context>

<pallas_src>
import math

import jax
import jax.numpy as jnp
from jax.experimental import pallas as pl
from jax.experimental.pallas import tpu as pltpu

_DEFAULT_BLOCK_BYTES = 8 * 1024 * 1024    # ~8 MiB of input per grid step
_VMEM_LIMIT_BYTES = 40 * 1024 * 1024      # 2x-buffered 8 MiB in+out tiles + slack
_MIN_BYTES_FOR_SPLIT = 2 * 1024 * 1024    # force >=2 grid steps above this size


def _scale_kernel(params_ref, x_ref, o_ref):
    """o = arg_min + arg_amp * x on one VMEM tile.

    params_ref: (2,) float32 in SMEM -> [arg_min, arg_amp].  For sub-32-bit
    float inputs we convert only the two scalars and keep the tensor data in
    its native dtype (v6e/v7x have bf16 VALUs); for f32 this is the plain f32
    path.
    """
    xv = x_ref[...]
    mn = params_ref[0]
    amp = params_ref[1]
    if xv.dtype == jnp.float32:
        o_ref[...] = mn + amp * xv
    else:
        o_ref[...] = mn.astype(xv.dtype) + amp.astype(xv.dtype) * xv


def _sublane(dtype) -> int:
    # f32 -> 8, bf16/f16 -> 16 (sub-32-bit dtypes pack along sublanes).
    return max(8, 32 // jnp.dtype(dtype).itemsize)


def _pick_width(n: int) -> int:
    """Widest lane-multiple slab width that divides n (zero-copy reshape);
    returns 0 if numel is not a multiple of 128 (ragged path)."""
    for w in (4096, 2048, 1024, 512, 256, 128):
        if n % w == 0:
            return w
    return 0


def _pallas_scale(operand, out_shape, in_spec, out_spec, grid, cost, alias,
                  params):
    return pl.pallas_call(
        _scale_kernel,
        out_shape=out_shape,
        grid_spec=pltpu.PrefetchScalarGridSpec(
            num_scalar_prefetch=0,
            grid=grid,
            in_specs=[
                pl.BlockSpec(memory_space=pltpu.MemorySpace.SMEM),  # params
                in_spec,                                            # tensor
            ],
            out_specs=out_spec,
        ),
        compiler_params=pltpu.CompilerParams(
            dimension_semantics=("parallel",),     # megacore-shard the grid axis
            vmem_limit_bytes=_VMEM_LIMIT_BYTES,
        ),
        cost_estimate=cost,
        input_output_aliases=alias,
    )(params, operand)


def _scale_slab(slab, params, target_block_bytes, cost, alias):
    """Lane-dense (rows, W) streaming path for numel % 128 == 0."""
    rows, w = slab.shape
    dtype = slab.dtype
    itemsize = jnp.dtype(dtype).itemsize
    sub = _sublane(dtype)

    # ~target_block_bytes of input per grid step, sublane-aligned.
    tr = max(sub, (target_block_bytes // (w * itemsize)) // sub * sub)
    # For big arrays make sure the grid has >= 2 steps so both v7x TensorCores
    # (dimension_semantics="parallel") drive HBM; skip for tiny arrays where an
    # extra ~0.35 us step is pure overhead.
    if rows * w * itemsize >= _MIN_BYTES_FOR_SPLIT and rows > sub:
        half = ((rows + 1) // 2 + sub - 1) // sub * sub
        tr = min(tr, half)
    tr = min(tr, rows)
    grid = (pl.cdiv(rows, tr),)   # last (possibly partial) block is masked

    spec = pl.BlockSpec((tr, w), lambda i: (i, 0))
    return _pallas_scale(slab, jax.ShapeDtypeStruct((rows, w), dtype),
                         spec, spec, grid, cost, alias, params)


def _scale_ragged(x, params, target_block_bytes, cost, alias):
    """numel % 128 != 0: no lane-dense slab view exists without a pad copy, so
    tile the original shape over its leading dim with full trailing dims.
    This keeps HBM traffic at the minimum 1 read + 1 write (the previous
    jnp.pad + slice fallback cost ~3x roofline traffic)."""
    if x.ndim == 0:
        x = x.reshape(1, 1)
    elif x.ndim == 1:
        x = x.reshape(1, -1)
    shape = x.shape
    dtype = x.dtype
    itemsize = jnp.dtype(dtype).itemsize
    nd = x.ndim
    d0 = shape[0]
    rest = shape[1:]
    rest_bytes = math.prod(rest) * itemsize

    # TODO(synk): if a single leading-dim slice ever exceeds VMEM (huge ragged
    # trailing dims), block the second dim as well; not a realistic NN case.
    t0 = max(1, min(d0, target_block_bytes // max(rest_bytes, 1)))
    if d0 * rest_bytes >= _MIN_BYTES_FOR_SPLIT and d0 > 1:
        t0 = min(t0, (d0 + 1) // 2)          # >= 2 steps for v7x megacore
    if nd == 2 and t0 < d0:
        # 2-D blocks: second-to-last block dim must be a multiple of 8 or full.
        t0 = min(max(8, t0 // 8 * 8), d0)
    grid = (pl.cdiv(d0, t0),)                # last partial block is masked

    block = (t0,) + rest
    zeros = (0,) * (nd - 1)
    spec = pl.BlockSpec(block, lambda i: (i,) + zeros)
    return _pallas_scale(x, jax.ShapeDtypeStruct(shape, dtype),
                         spec, spec, grid, cost, alias, params)


def scale_to_range(x: jax.Array, arg_min, arg_amp, *,
                   target_block_bytes: int = _DEFAULT_BLOCK_BYTES,
                   donate_x: bool = False) -> jax.Array:
    """out = arg_min + arg_amp * x, elementwise, any shape / float dtype.

    Set donate_x=True only when the caller no longer needs x: the kernel then
    aliases the input buffer as the output (no second full-size allocation).
    """
    orig_shape = x.shape
    if x.size == 0:
        return x
    if not jnp.issubdtype(x.dtype, jnp.floating):
        # torch `float_scalar * int_tensor` promotes to float; mirror that.
        x = x.astype(jnp.float32)
    dtype = x.dtype
    itemsize = jnp.dtype(dtype).itemsize
    n = x.size

    params = jnp.stack([jnp.asarray(arg_min, jnp.float32),
                        jnp.asarray(arg_amp, jnp.float32)])
    cost = pl.CostEstimate(flops=2 * n, transcendentals=0,
                           bytes_accessed=2 * n * itemsize)
    alias = {1: 0} if donate_x else {}

    w = _pick_width(n)
    if w:
        out = _scale_slab(x.reshape(-1, w), params, target_block_bytes,
                          cost, alias)
    else:
        out = _scale_ragged(x, params, target_block_bytes, cost, alias)
    return out.reshape(orig_shape)


if __name__ == "__main__":
    arg_min = -1.0
    arg_amp = 2.0
    key = jax.random.PRNGKey(0)
    k0, k1, k2, k3, k4 = jax.random.split(key, 5)

    # Main check: small NCHW f32 input through the lane-dense slab path, jitted
    # (params are runtime values, so new (arg_min, arg_amp) never recompile).
    x = jax.random.uniform(k0, (2, 4, 16, 16), dtype=jnp.float32)
    fn = jax.jit(scale_to_range,
                 static_argnames=("target_block_bytes", "donate_x"))
    out = jax.block_until_ready(fn(x, arg_min, arg_amp))
    ref = arg_min + arg_amp * x
    assert out.shape == x.shape and out.dtype == x.dtype
    assert jnp.allclose(out, ref, atol=1e-6), "mismatch vs reference (main)"

    # Partial last row-block (13 rows with 8-row tiles -> boundary-masked).
    x2 = jax.random.normal(k1, (13, 128), dtype=jnp.float32)
    out2 = jax.block_until_ready(
        scale_to_range(x2, arg_min, arg_amp, target_block_bytes=4096))
    assert jnp.allclose(out2, arg_min + arg_amp * x2, atol=1e-6), \
        "mismatch vs reference (partial block)"

    # Ragged numel (3*5*7 % 128 != 0): original-shape tiling, no pad/slice.
    x3 = jax.random.normal(k2, (3, 5, 7), dtype=jnp.float32)
    out3 = jax.block_until_ready(scale_to_range(x3, arg_min, arg_amp))
    assert jnp.allclose(out3, arg_min + arg_amp * x3, atol=1e-6), \
        "mismatch vs reference (ragged 3D)"

    # Ragged 1-D vector.
    x4 = jax.random.normal(k3, (1000,), dtype=jnp.float32)
    out4 = jax.block_until_ready(scale_to_range(x4, arg_min, arg_amp))
    assert jnp.allclose(out4, arg_min + arg_amp * x4, atol=1e-6), \
        "mismatch vs reference (ragged 1D)"

    # bf16 input: native-dtype compute + opt-in input/output aliasing.
    x5 = jax.random.normal(k4, (8, 256), dtype=jnp.bfloat16)
    out5 = jax.block_until_ready(
        scale_to_range(x5, arg_min, arg_amp, donate_x=True))
    ref5 = arg_min + arg_amp * x5.astype(jnp.float32)
    assert out5.dtype == jnp.bfloat16
    assert jnp.allclose(out5.astype(jnp.float32), ref5, atol=5e-2, rtol=5e-2), \
        "mismatch vs reference (bf16)"

    print("KERNEL_OK")
</pallas_src>

<mosaic_0001>
module attributes {stable_mosaic.version = 11 : i64} {
  func.func @_scale_kernel(%arg0: i32, %arg1: memref<2xf32, #tpu.memory_space<smem>>, %arg2: memref<1x2048xf32, #tpu.memory_space<vmem>>, %arg3: memref<1x2048xf32, #tpu.memory_space<vmem>>) attributes {dimension_semantics = [#tpu.dimension_semantics<parallel>], iteration_bounds = array<i64: 1>, scalar_prefetch = 0 : i64, scratch_operands = 0 : i64, tpu.core_type = #tpu.core_type<tc>, window_params = [{transform_indices = @transform_0, window_bounds = array<i64: 2>}, {transform_indices = @transform_1, window_bounds = array<i64: 1, 2048>}, {transform_indices = @transform_2, window_bounds = array<i64: 1, 2048>}]} {
    %c0 = arith.constant 0 : index
    %c0_0 = arith.constant 0 : index
    %0 = vector.load %arg2[%c0, %c0_0] : memref<1x2048xf32, #tpu.memory_space<vmem>>, vector<1x2048xf32>
    %c0_1 = arith.constant 0 : index
    %1 = memref.load %arg1[%c0_1] : memref<2xf32, #tpu.memory_space<smem>>
    %c1 = arith.constant 1 : index
    %2 = memref.load %arg1[%c1] : memref<2xf32, #tpu.memory_space<smem>>
    %3 = vector.broadcast %2 : f32 to vector<1x2048xf32>
    %4 = arith.mulf %3, %0 : vector<1x2048xf32>
    %5 = vector.broadcast %1 : f32 to vector<1x2048xf32>
    %6 = arith.addf %5, %4 : vector<1x2048xf32>
    %c0_2 = arith.constant 0 : index
    %c0_3 = arith.constant 0 : index
    %7 = vector.load %arg3[%c0_2, %c0_3] : memref<1x2048xf32, #tpu.memory_space<vmem>>, vector<1x2048xf32>
    tpu.vector_store %arg3[%c0_2, %c0_3], %6 {strides = array<i32>} : memref<1x2048xf32, #tpu.memory_space<vmem>>, vector<1x2048xf32>,
    return
  }
  func.func @transform_0(%arg0: i32) -> i32 {
    %c0_i32 = arith.constant 0 : i32
    %c0_i32_0 = arith.constant 0 : i32
    return %c0_i32 : i32
  }
  func.func @transform_1(%arg0: i32) -> (i32, i32) {
    %c0_i32 = arith.constant 0 : i32
    %c0_i32_0 = arith.constant 0 : i32
    return %arg0, %c0_i32 : i32, i32
  }
  func.func @transform_2(%arg0: i32) -> (i32, i32) {
    %c0_i32 = arith.constant 0 : i32
    %c0_i32_0 = arith.constant 0 : i32
    return %arg0, %c0_i32 : i32, i32
  }
}

</mosaic_0001>

<bundles_post_ra>
// kernel: scale_to_range.1
= control target key start
LH: loop header
LB: loop body
LE: loop exit
PB: predicated region body
PF: predicated region fallthrough
CT: control target
= control target key end

     0   :  { %7 = vsyncpa [#allocation3], 0  ;;  %s88_s0 = inlined_call_operand.vmem [shape: f32[2], index: 0, kind: input, shape index: {}]   ;;  %s89_s1 = inlined_call_operand.vmem [shape: f32[1,2048], index: 1, kind: input, shape index: {}]   ;;  %s90_s2 = inlined_call_operand.vmem [shape: f32[1,2048], index: 2, kind: output, shape index: {}]  }
   0x1   :  { %s14_s11 = sshll.u32 %s88_s0, 4  ;;  %s15_s11 = int_to_ptr.vmem [resolvable:$true] %s14_s11 }
   0x2   :  { %s43_s12 = scalar_lea.vmem %s15_s11, 16  ;;  %p48_p1 = scmp.lt.s32.totalorder %s15_s11, %s15_s11 }
   0x3   :  { %p44_p0 = scmp.ne.s32.totalorder %s15_s11, %s43_s12  ;;  %p49_p2 = scmp.lt.s32.totalorder %s43_s12, %s43_s12 }
   0x5   :  { %p50_p3 = por %p49_p2, %p48_p1 }
   0x7   :  { %p51_p4 = pnand %p50_p3, %p44_p0 }
   0x9   :  { %54 = shalt.err (!%p51_p4)
}
   0xa   :  { %s57_s13 = smov [#allocation2]  }
   0xb   :  { %17 = dma.vmem_to_smem %s15_s11, 16, %s57_s13, [#allocation3]  }
   0xc   :  { %55 = dma.done.wait [#allocation3], 16  }
   0xd   :  { %56 = vsyncadd [#allocation3], 4294967280 }
   0xe   :  { %23 = sfence }
   0xf   :  { %s26_s14 = sld [smem:[#allocation2]]  ;;  %v24_v0 = vld [vmem:[%s89_s1] sm:$0xff]  ;;  %v25_v1 = vld [vmem:[%s89_s1 + $0x8] sm:$0xff] }
  0x10   :  { %s41_s15 = sld [smem:[#allocation2 + $0x1]] }
  0x15   :  { %v31_v3 = vstv %s26_s14 }
  0x16   :  { %v28_v2 = vstv %s41_s15 }
  0x17   :  { %v29_v4 = vmul.f32 %v28_v2, %v24_v0  ;;  %v30_v5 = vmul.f32 %v28_v2, %v25_v1 }
  0x19   :  { %v32_v6 = vadd.f32 %v31_v3, %v29_v4  ;;  %v33_v7 = vadd.f32 %v31_v3, %v30_v5 }
  0x1b   :  { %34 = vst [vmem:[%s90_s2] sm:$0xff] %v32_v6  ;;  %35 = vst [vmem:[%s90_s2 + $0x8] sm:$0xff] %v33_v7 }
  0x1c   :  { %40 = vsyncpa [#allocation3], 1 }

</bundles_post_ra>
